<compile_context>
chip_gen: v5e
topology: v5e:2x2
jax: 0.10.0
libtpu: 0.0.40
codegen_flags: <defaults>
</compile_context>

<pallas_src>
import functools

import jax
import jax.numpy as jnp
from jax.experimental import pallas as pl
from jax.experimental.pallas import tpu as pltpu


# ---------------------------------------------------------------------------
# Helpers
# ---------------------------------------------------------------------------
def _cdiv(a, b):
    return (a + b - 1) // b


def _round_up(a, m):
    return _cdiv(a, m) * m


def _vmem_budget_and_limit():
    """Generation-aware VMEM budget (v5e/v6e: 128 MiB/TC, v7x: 64 MiB/TC)."""
    cap = None
    try:
        info = pltpu.get_tpu_info()
        cap = int(getattr(info, "vmem_capacity_bytes", 0)) or None
    except Exception:
        cap = None
    if cap is None:
        cap = 64 * 1024 * 1024  # conservative fallback (v7x per-TC size)
    limit = max(32 * 1024 * 1024, cap - 16 * 1024 * 1024)   # headroom for Mosaic
    budget = max(16 * 1024 * 1024, limit - 8 * 1024 * 1024)  # what we tile against
    return budget, limit


def _choose_weight_tiles(K, N, w_bytes, budget):
    """Pick (tk, tn): prefer the whole (K, N) weight resident; otherwise tile K
    first (keeps the output block whole), then N.  Footprints include
    sublane/lane layout padding and conservatively assume double buffering."""
    half = max(budget // 2, 1)
    tk_cands = [K] + [t for t in (2048, 1024, 512, 256, 128) if t < K]
    tn_cands = [N] + [t for t in (2048, 1024, 512, 256, 128) if t < N]

    def footprint(tk, tn):
        return 2 * _round_up(tk, 8) * _round_up(tn, 128) * w_bytes

    for tn in tn_cands:
        for tk in tk_cands:
            if footprint(tk, tn) <= half:
                return tk, tn
    return tk_cands[-1], tn_cands[-1]


def _choose_tile_b(B, tk, tn, w_bytes, out_bytes, budget, min_steps=4):
    """Largest multiple-of-8 batch tile that fits the VMEM budget (accounting
    for lane/sublane layout padding), clamped so the grid keeps >= min_steps
    batch steps for v7x megacore sharding when B is large."""
    lane_k = _round_up(tk, 128)
    lane_n = _round_up(tn, 128)
    fixed = (2 * _round_up(tk, 8) * lane_n * w_bytes   # weight (2x buffered, worst case)
             + 2 * 8 * lane_n * 4)                     # bias (f32, 8-sublane pad)
    per_row = (2 * lane_k * 4                          # x tile (f32 in VMEM, 2x buffered)
               + 2 * lane_n * out_bytes                # out tile (2x buffered)
               + lane_n * 4)                           # f32 accumulator scratch
    avail = max(budget - fixed, 8 * per_row)
    tile_b = max(8, (avail // per_row // 8) * 8)
    tile_b = min(tile_b, 8192)                         # sanity cap on a single DMA
    tile_b = min(tile_b, _round_up(B, 8))
    if B > 8 * min_steps:
        tile_b = min(tile_b, _round_up(_cdiv(B, min_steps), 8))
    return int(max(8, tile_b))


def _weight_spec(shape, index_map, single_buffer):
    """Weight BlockSpec; single-buffer it when its block is constant across the
    grid and large enough for the VMEM saving to matter."""
    if single_buffer:
        try:
            return pl.BlockSpec(shape, index_map, pipeline_mode=pl.Buffered(1))
        except Exception:  # pipeline_mode / Buffered unavailable: fall back
            pass
    return pl.BlockSpec(shape, index_map)


# ---------------------------------------------------------------------------
# Kernel
# ---------------------------------------------------------------------------
def _feature_extractor_kernel(x_ref, w_ref, b_ref, o_ref, acc_ref, *,
                              activation, nk, tk, k_rem, x_cast_dtype):
    # x: (TILE_B, tk), w: (tk, tn), b: (1, tn) f32, o: (TILE_B, tn)
    k = pl.program_id(2)

    @pl.when(k == 0)
    def _init():
        acc_ref[...] = jnp.zeros_like(acc_ref)

    x = x_ref[...]
    w = w_ref[...]
    if k_rem:
        # Ragged last K block: zero out-of-range x columns / w rows so padded
        # garbage never reaches the MXU accumulator (VPU ops, ~free).
        limit = jnp.where(k == nk - 1, k_rem, tk)
        col = jax.lax.broadcasted_iota(jnp.int32, x.shape, 1)
        x = jnp.where(col < limit, x, jnp.zeros_like(x))
        row = jax.lax.broadcasted_iota(jnp.int32, w.shape, 0)
        w = jnp.where(row < limit, w, jnp.zeros_like(w))
    if x_cast_dtype is not None:
        # In-kernel cast (e.g. f32 -> bf16 for the MXU); avoids a separate
        # wrapper-side XLA pass over all of x.
        x = x.astype(x_cast_dtype)

    acc_ref[...] += jnp.dot(x, w, preferred_element_type=jnp.float32)

    @pl.when(k == nk - 1)
    def _finalize():
        y = acc_ref[...] + b_ref[...]            # bias add in f32
        if activation == "relu":
            y = jnp.maximum(y, 0.0)
        elif activation == "tanh":
            y = jnp.tanh(y)
        # "identity": no-op
        o_ref[...] = y.astype(o_ref.dtype)


# ---------------------------------------------------------------------------
# Wrappers
# ---------------------------------------------------------------------------
def prepare_feature_extractor_params(weight, bias, *, use_bf16=False):
    """One-time parameter layout (cache the result across calls):
    transpose nn.Linear's (N, K) weight to (K, N) for a native MXU feed and
    optionally cast it to bf16; bias stays f32 as (1, N)."""
    w_t = jnp.asarray(weight).T
    if use_bf16:
        w_t = w_t.astype(jnp.bfloat16)
    b2d = jnp.asarray(bias).reshape(1, -1).astype(jnp.float32)
    return w_t, b2d


def feature_extractor_apply(x, w_t, bias2d, *, activation="relu",
                            out_dtype=None, tiling_override=None):
    """Apply the Pallas Linear+activation kernel with pre-laid-out params.

    x:       (B, K) — any float dtype; cast to the weight dtype in-kernel.
    w_t:     (K, N) — pre-transposed (and optionally bf16) weight.
    bias2d:  (1, N) float32.
    out_dtype: output dtype (default: x.dtype); bf16 halves store traffic.
    tiling_override: (tile_b, tn, tk) for tests / manual tuning.
    """
    if activation not in ("relu", "tanh", "identity"):
        # TODO(synk): the PyTorch module accepts an arbitrary callable; only
        # relu / tanh / identity are implemented here.
        raise ValueError(f"unsupported activation: {activation}")

    B, K = x.shape
    Kw, N = w_t.shape
    assert Kw == K, (Kw, K)
    if N == 0:
        return jnp.zeros((0,), dtype=x.dtype)

    out_dtype = jnp.dtype(out_dtype) if out_dtype is not None else x.dtype
    w_bytes = jnp.dtype(w_t.dtype).itemsize
    out_bytes = jnp.dtype(out_dtype).itemsize

    budget, vmem_limit = _vmem_budget_and_limit()
    if tiling_override is not None:
        tile_b, tn, tk = tiling_override
    else:
        tk, tn = _choose_weight_tiles(K, N, w_bytes, budget)
        tile_b = _choose_tile_b(B, tk, tn, w_bytes, out_bytes, budget)

    nb, nn, nk = _cdiv(B, tile_b), _cdiv(N, tn), _cdiv(K, tk)
    k_rem = K % tk  # 0 when the K blocks tile K exactly (no masking needed)

    # Cast x inside the kernel only when its dtype differs from the weight's.
    x_cast_dtype = w_t.dtype if w_t.dtype != x.dtype else None

    # Single-buffer the weight when its block never changes and is big enough
    # for the saved VMEM to buy a larger batch tile.
    w_block_bytes = _round_up(tk, 8) * _round_up(tn, 128) * w_bytes
    w_single = (nk == 1 and nn == 1 and w_block_bytes >= (1 << 20))

    kernel = functools.partial(
        _feature_extractor_kernel, activation=activation, nk=nk, tk=tk,
        k_rem=k_rem, x_cast_dtype=x_cast_dtype)

    out = pl.pallas_call(
        kernel,
        out_shape=jax.ShapeDtypeStruct((B, N), out_dtype),
        grid=(nb, nn, nk),
        in_specs=[
            # x: one batch tile per i step (double-buffered by the pipeline).
            pl.BlockSpec((tile_b, tk), lambda i, j, k: (i, k)),
            # weight: (k, j) blocks; resident (and optionally single-buffered)
            # when nk == nn == 1.
            _weight_spec((tk, tn), lambda i, j, k: (k, j), w_single),
            # bias: f32, tiny.
            pl.BlockSpec((1, tn), lambda i, j, k: (0, j)),
        ],
        out_specs=pl.BlockSpec((tile_b, tn), lambda i, j, k: (i, j)),
        scratch_shapes=[pltpu.VMEM((tile_b, tn), jnp.float32)],
        compiler_params=pltpu.CompilerParams(
            dimension_semantics=("parallel", "parallel", "arbitrary"),
            vmem_limit_bytes=int(vmem_limit),
        ),
    )(x, w_t, bias2d)
    return out


def feature_extractor(x, weight, bias, *, activation="relu", use_bf16=False,
                      out_dtype=None):
    """Pallas equivalent of FeatureExtractor.forward (nn.Linear layout params).

    For repeated calls, prefer prepare_feature_extractor_params(...) once and
    feature_extractor_apply(...) per call so the weight transpose / cast does
    not cost an extra HBM pass on every invocation.
    """
    output_size = weight.shape[0]
    if output_size == 0:
        return jnp.zeros((0,), dtype=x.dtype)   # torch.zeros(0) branch
    w_t, b2d = prepare_feature_extractor_params(weight, bias, use_bf16=use_bf16)
    return feature_extractor_apply(x, w_t, b2d, activation=activation,
                                   out_dtype=out_dtype)


# ---------------------------------------------------------------------------
# Demo / self-test
# ---------------------------------------------------------------------------
if __name__ == "__main__":
    batch = 8
    input_size = 32
    output_size = 16

    key = jax.random.PRNGKey(0)
    kx, kw, kb = jax.random.split(key, 3)

    x = jax.random.normal(kx, (batch, input_size), dtype=jnp.float32)
    bound = 1.0 / (input_size ** 0.5)
    weight = jax.random.uniform(kw, (output_size, input_size), dtype=jnp.float32,
                                minval=-bound, maxval=bound)
    bias = jax.random.uniform(kb, (output_size,), dtype=jnp.float32,
                              minval=-bound, maxval=bound)

    ref = jnp.maximum(x @ weight.T + bias, 0.0)

    # f32 path via the cached-params API (prep once, apply many times).
    w_t, b2d = prepare_feature_extractor_params(weight, bias)
    out = jax.block_until_ready(
        feature_extractor_apply(x, w_t, b2d, activation="relu"))
    assert out.shape == (batch, output_size)
    assert jnp.allclose(out, ref, atol=1e-5, rtol=1e-5)

    # tanh path via the convenience wrapper.
    out_t = jax.block_until_ready(
        feature_extractor(x, weight, bias, activation="tanh"))
    assert jnp.allclose(out_t, jnp.tanh(x @ weight.T + bias), atol=1e-5, rtol=1e-5)

    # bf16-MXU path: weight pre-cast once, x cast in-kernel (f32 accumulation).
    out_bf = jax.block_until_ready(
        feature_extractor(x, weight, bias, activation="relu", use_bf16=True))
    assert jnp.allclose(out_bf, ref, atol=5e-2, rtol=5e-2)

    # Exercise the K-tiled path (accumulator + pl.when + ragged-K masking) on a
    # layer whose reduction dim is not a multiple of the K tile.
    k2, n2, b2 = 200, 24, 16
    x2 = jax.random.normal(kx, (b2, k2), dtype=jnp.float32)
    w2 = jax.random.normal(kw, (n2, k2), dtype=jnp.float32) * 0.05
    bias2 = jax.random.normal(kb, (n2,), dtype=jnp.float32) * 0.05
    w2_t, b2_2d = prepare_feature_extractor_params(w2, bias2)
    out2 = jax.block_until_ready(
        feature_extractor_apply(x2, w2_t, b2_2d, activation="relu",
                                tiling_override=(8, n2, 128)))
    ref2 = jnp.maximum(x2 @ w2.T + bias2, 0.0)
    assert jnp.allclose(out2, ref2, atol=1e-4, rtol=1e-4)

    # output_size == 0 branch (no kernel launched).
    empty = feature_extractor(x, jnp.zeros((0, input_size)), jnp.zeros((0,)))
    assert empty.shape == (0,)

    print("KERNEL_OK")
</pallas_src>

<mosaic_0001>
module attributes {stable_mosaic.version = 11 : i64} {
  func.func @_feature_extractor_kernel(%arg0: i32, %arg1: i32, %arg2: i32, %arg3: memref<8x32xf32, #tpu.memory_space<vmem>>, %arg4: memref<32x16xf32, #tpu.memory_space<vmem>>, %arg5: memref<1x16xf32, #tpu.memory_space<vmem>>, %arg6: memref<8x16xf32, #tpu.memory_space<vmem>>, %arg7: memref<8x16xf32, #tpu.memory_space<vmem>>) attributes {dimension_semantics = [#tpu.dimension_semantics<parallel>, #tpu.dimension_semantics<parallel>, #tpu.dimension_semantics<arbitrary>], iteration_bounds = array<i64: 1, 1, 1>, scalar_prefetch = 0 : i64, scratch_operands = 1 : i64, tpu.core_type = #tpu.core_type<tc>, window_params = [{transform_indices = @transform_0, window_bounds = array<i64: 8, 32>}, {transform_indices = @transform_1, window_bounds = array<i64: 32, 16>}, {transform_indices = @transform_2, window_bounds = array<i64: 1, 16>}, {transform_indices = @transform_3, window_bounds = array<i64: 8, 16>}]} {
    %c0_i32 = arith.constant 0 : i32
    %0 = arith.cmpi eq, %arg2, %c0_i32 : i32
    %1 = arith.extui %0 : i1 to i32
    %c0_i32_0 = arith.constant 0 : i32
    %2 = arith.cmpi ne, %1, %c0_i32_0 : i32
    scf.if %2 {
      %cst_10 = arith.constant 0.000000e+00 : f32
      %12 = vector.broadcast %cst_10 : f32 to vector<8x16xf32>
      %c0_11 = arith.constant 0 : index
      %c0_12 = arith.constant 0 : index
      %13 = vector.load %arg7[%c0_11, %c0_12] : memref<8x16xf32, #tpu.memory_space<vmem>>, vector<8x16xf32>
      tpu.vector_store %arg7[%c0_11, %c0_12], %12 {strides = array<i32>} : memref<8x16xf32, #tpu.memory_space<vmem>>, vector<8x16xf32>,
    } else {
    }
    %c0 = arith.constant 0 : index
    %c0_1 = arith.constant 0 : index
    %3 = vector.load %arg3[%c0, %c0_1] : memref<8x32xf32, #tpu.memory_space<vmem>>, vector<8x32xf32>
    %c0_2 = arith.constant 0 : index
    %c0_3 = arith.constant 0 : index
    %4 = vector.load %arg4[%c0_2, %c0_3] : memref<32x16xf32, #tpu.memory_space<vmem>>, vector<32x16xf32>
    %c0_4 = arith.constant 0 : index
    %c0_5 = arith.constant 0 : index
    %5 = vector.load %arg7[%c0_4, %c0_5] : memref<8x16xf32, #tpu.memory_space<vmem>>, vector<8x16xf32>
    %cst = arith.constant dense<0.000000e+00> : vector<8x16xf32>
    %6 = tpu.matmul %3, %4, %cst {dimension_numbers = #tpu.dot_dimension_numbers<[1], [0], [0], [1], [0, 0, 1, 1], [], []>} : vector<8x32xf32>, vector<32x16xf32>, vector<8x16xf32> -> vector<8x16xf32>
    %7 = arith.addf %5, %6 : vector<8x16xf32>
    %c0_6 = arith.constant 0 : index
    %c0_7 = arith.constant 0 : index
    %8 = vector.load %arg7[%c0_6, %c0_7] : memref<8x16xf32, #tpu.memory_space<vmem>>, vector<8x16xf32>
    tpu.vector_store %arg7[%c0_6, %c0_7], %7 {strides = array<i32>} : memref<8x16xf32, #tpu.memory_space<vmem>>, vector<8x16xf32>,
    %c0_i32_8 = arith.constant 0 : i32
    %9 = arith.cmpi eq, %arg2, %c0_i32_8 : i32
    %10 = arith.extui %9 : i1 to i32
    %c0_i32_9 = arith.constant 0 : i32
    %11 = arith.cmpi ne, %10, %c0_i32_9 : i32
    scf.if %11 {
      %c0_10 = arith.constant 0 : index
      %c0_11 = arith.constant 0 : index
      %12 = vector.load %arg7[%c0_10, %c0_11] : memref<8x16xf32, #tpu.memory_space<vmem>>, vector<8x16xf32>
      %c0_12 = arith.constant 0 : index
      %c0_13 = arith.constant 0 : index
      %13 = vector.load %arg5[%c0_12, %c0_13] : memref<1x16xf32, #tpu.memory_space<vmem>>, vector<1x16xf32>
      %14 = vector.broadcast %13 : vector<1x16xf32> to vector<8x16xf32>
      %15 = arith.addf %12, %14 : vector<8x16xf32>
      %cst_14 = arith.constant 0.000000e+00 : f32
      %16 = vector.broadcast %cst_14 : f32 to vector<8x16xf32>
      %17 = arith.maximumf %15, %16 : vector<8x16xf32>
      %c0_15 = arith.constant 0 : index
      %c0_16 = arith.constant 0 : index
      %18 = vector.load %arg6[%c0_15, %c0_16] : memref<8x16xf32, #tpu.memory_space<vmem>>, vector<8x16xf32>
      tpu.vector_store %arg6[%c0_15, %c0_16], %17 {strides = array<i32>} : memref<8x16xf32, #tpu.memory_space<vmem>>, vector<8x16xf32>,
    } else {
    }
    return
  }
  func.func @transform_0(%arg0: i32, %arg1: i32, %arg2: i32) -> (i32, i32) {
    %c0_i32 = arith.constant 0 : i32
    return %arg0, %arg2 : i32, i32
  }
  func.func @transform_1(%arg0: i32, %arg1: i32, %arg2: i32) -> (i32, i32) {
    %c0_i32 = arith.constant 0 : i32
    return %arg2, %arg1 : i32, i32
  }
  func.func @transform_2(%arg0: i32, %arg1: i32, %arg2: i32) -> (i32, i32) {
    %c0_i32 = arith.constant 0 : i32
    %c0_i32_0 = arith.constant 0 : i32
    return %c0_i32, %arg1 : i32, i32
  }
  func.func @transform_3(%arg0: i32, %arg1: i32, %arg2: i32) -> (i32, i32) {
    %c0_i32 = arith.constant 0 : i32
    return %arg0, %arg1 : i32, i32
  }
}

</mosaic_0001>

<bundles_post_ra>
// kernel: tpu_custom_call.1
= control target key start
LH: loop header
LB: loop body
LE: loop exit
PB: predicated region body
PF: predicated region fallthrough
CT: control target
= control target key end

     0   :  { %vm19_vm0 = vcmask 130048   ;;  %v111_v2 = vmov 0.0   ;;  %s157_s0 = inlined_call_operand.vmem [shape: f32[8,32], index: 0, kind: input, shape index: {}]   ;;  %s158_s1 = inlined_call_operand.vmem [shape: f32[32,16], index: 1, kind: input, shape index: {}]   ;;  %s159_s2 = inlined_call_operand.vmem [shape: f32[1,16], index: 2, kind: input, shape index: {}]   ;;  %s160_s3 = inlined_call_operand.hbm [shape: f32[8,16], index: 3, kind: output, shape index: {}]  }
   0x1   :  { %v25_v0 = vld [vmem:[%s158_s1 + $0x18] sm:$0xff]  ;;  %v24_v1 = vld [vmem:[%s158_s1 + $0x10] sm:$0xff]  ;;  %20 = vst.msk [vmem:[#allocation2] sm:$0xff] %vm19_vm0, %v111_v2 }
   0x2   :  { %43 = vmatpush.msra.mxu0 %v25_v0 }
   0x3   :  { %8 = vsyncpa [#allocation4], 0  ;;  %v23_v3 = vld [vmem:[%s158_s1 + $0x8] sm:$0xff]  ;;  %v22_v4 = vld [vmem:[%s158_s1] sm:$0xff]  ;;  %vm27_vm1 = vcmask 261120   ;;  %s112_s24 = smov [#allocation3]  }
   0x4   :  { %44 = vmatpush.msra.mxu0 %v24_v1  ;;  %v21_v5 = vld [vmem:[%s157_s0] sm:$0xff]  ;;  %s70_s1 = sshll.u32 %s112_s24, 4  ;;  %s72_s27 = sshll.u32 %s160_s3, 4  ;;  %s71_s1 = int_to_ptr.vmem [resolvable:$true] %s70_s1  ;;  %s73_s27 = int_to_ptr.hbm [resolvable:$true] %s72_s27 }
   0x5   :  { %v84_v9 = vld [vmem:[%s159_s2] ss:$0 sm:$0xff] }
   0x6   :  { %45 = vmatpush.msra.mxu0 %v23_v3 }
   0x8   :  { %46 = vmatpush.msra.mxu0 %v22_v4  ;;  %v26_v6 = vld [vmem:[#allocation2] sm:$0xff] }
   0x9   :  { %81 = vmatmul.msk.f32.vlgmr.msra.gmra.mxu0 %vm27_vm1, %v21_v5 }
  0x86   :  { %v48_v7 = vpop.f32.mrf.mxu0 }
  0x87   :  { %v51_v8 = vadd.f32 %v48_v7, %v26_v6 }
  0x89   :  { %53 = vst.msk [vmem:[#allocation2] sm:$0xff] %vm19_vm0, %v51_v8 }
  0x90   :  { %v57_v10 = vld [vmem:[#allocation2] sm:$0xff] }
  0x91   :  { %v62_v11 = vadd.f32 %v84_v9, %v57_v10 }
  0x93   :  { %v63_v12 = vmax.f32 %v62_v11, 0.0 }
  0x95   :  { %64 = vst.msk [vmem:[#allocation3] sm:$0xff] %vm19_vm0, %v63_v12 }
  0x96   :  { %75 = dma.vmem_to_hbm [thread:$0]  %s71_s1, 128, %s73_s27, [#allocation4]  }
  0x97   :  { %109 = dma.done.wait [#allocation4], 128  }
  0x98   :  { %110 = vsyncadd [#allocation4], 4294967168 }
  0x99   :  { %80 = vsyncpa [#allocation4], 1 }

</bundles_post_ra>
